<compile_context>
chip_gen: v7x
topology: tpu7x:2x2x1
jax: 0.10.0
libtpu: 0.0.40
codegen_flags: <defaults>
</compile_context>

<pallas_src>
import functools

import jax
import jax.numpy as jnp
from jax import lax
from jax.experimental import pallas as pl
from jax.experimental.pallas import tpu as pltpu

# Contract last dim of x with last dim of y (transposed-RHS contraction).
_CONTRACT_LAST = (((1,), (1,)), ((), ()))


# ----------------------------- kernels ------------------------------------- #

def _dot_kernel(x_ref, y_ref, o_ref, *, inv_temp, precision):
    # x_ref: (bn, D), y_ref: (bm, D), o_ref: (bn, bm)
    num = lax.dot_general(x_ref[...], y_ref[...], _CONTRACT_LAST,
                          preferred_element_type=jnp.float32, precision=precision)
    o_ref[...] = (num * inv_temp).astype(o_ref.dtype)


def _cos_kernel(x_ref, y_ref, xinv_ref, yinv_ref, o_ref, *, inv_temp, precision):
    # xinv_ref: (bn, 1), yinv_ref: (1, bm); 1/temp folded into the row vector.
    num = lax.dot_general(x_ref[...], y_ref[...], _CONTRACT_LAST,
                          preferred_element_type=jnp.float32, precision=precision)
    o_ref[...] = (num * (xinv_ref[...] * inv_temp) * yinv_ref[...]).astype(o_ref.dtype)


def _dot_kernel_ksplit(x_ref, y_ref, o_ref, acc_ref, *, inv_temp, precision):
    k = pl.program_id(2)

    @pl.when(k == 0)
    def _():
        acc_ref[...] = jnp.zeros_like(acc_ref)

    acc_ref[...] += lax.dot_general(x_ref[...], y_ref[...], _CONTRACT_LAST,
                                    preferred_element_type=jnp.float32,
                                    precision=precision)

    @pl.when(k == pl.num_programs(2) - 1)
    def _():
        o_ref[...] = (acc_ref[...] * inv_temp).astype(o_ref.dtype)


def _cos_kernel_ksplit(x_ref, y_ref, xinv_ref, yinv_ref, o_ref, acc_ref, *,
                       inv_temp, precision):
    k = pl.program_id(2)

    @pl.when(k == 0)
    def _():
        acc_ref[...] = jnp.zeros_like(acc_ref)

    acc_ref[...] += lax.dot_general(x_ref[...], y_ref[...], _CONTRACT_LAST,
                                    preferred_element_type=jnp.float32,
                                    precision=precision)

    @pl.when(k == pl.num_programs(2) - 1)
    def _():
        o_ref[...] = (acc_ref[...] * (xinv_ref[...] * inv_temp)
                      * yinv_ref[...]).astype(o_ref.dtype)


# ----------------------------- wrapper -------------------------------------- #

def _round_up(x, m):
    return ((x + m - 1) // m) * m


def _sublane_pack(*dtypes):
    # Rows per sublane tile for the narrowest dtype involved (f32:8 bf16:16 i8/fp8:32).
    min_itemsize = min(jnp.dtype(d).itemsize for d in dtypes)
    return {4: 8, 2: 16, 1: 32}.get(min_itemsize, 8)


def _vmem_budget_bytes():
    try:
        cap = int(pltpu.get_tpu_info().vmem_capacity_bytes)
    except Exception:
        cap = 64 << 20  # conservative (v7x-sized) fallback
    # Leave headroom for the compiler's own scratch / pipeline buffers:
    # ~48 MiB on a 64 MiB chip, capped at 100 MiB on 128 MiB chips.
    return max(16 << 20, min(int(cap * 0.75), 100 << 20))


def similarity(x, y, temp, sim_type: str = "dot", *, block_n=None, block_m=None,
               block_k: int = 512, out_dtype=jnp.float32, eps: float = 1e-8):
    """Pallas implementation of Similarity.forward.  x: (N, D), y: (M, D) -> (N, M)."""
    N, D = x.shape
    M, Dy = y.shape
    assert D == Dy, "feature dims must match"
    inv_temp = 1.0 / float(temp)

    in_itemsize = jnp.dtype(x.dtype).itemsize
    out_itemsize = jnp.dtype(out_dtype).itemsize
    sub = _sublane_pack(x.dtype, out_dtype)
    budget = _vmem_budget_bytes()

    # f32 inputs -> exact (HIGHEST) MXU passes; bf16/narrower -> native fast path.
    precision = lax.Precision.HIGHEST if jnp.dtype(x.dtype) == jnp.float32 else None

    # Generation-aware defaults: bigger row tiles where VMEM allows (v5e/v6e)
    # and the problem is compute-heavy; 256x256 otherwise.
    if block_n is None:
        block_n = 512 if (budget >= (80 << 20) and D >= 2048) else 256
    if block_m is None:
        block_m = 256

    # dtype-aware sublane / lane alignment, shrink for small problems.
    block_n = max(sub, min(block_n, _round_up(N, sub)))
    block_m = max(128, min(block_m, _round_up(M, 128)))

    # Keep >= 2 grid blocks along a parallel axis when possible so a dual-TC
    # chip (v7x) can shard the grid; harmless on single-TC chips.
    if pl.cdiv(N, block_n) == 1 and pl.cdiv(M, block_m) == 1:
        if M > 128:
            block_m = 128
        elif N > 2 * sub:
            block_n = _round_up(pl.cdiv(N, 2), sub)

    # Decide on a K-split: full-D operand tiles (double-buffered) must fit
    # comfortably; otherwise tile the contraction dim with an f32 accumulator.
    ksplit = (2 * (block_n + block_m) * D * in_itemsize > min(24 << 20, budget // 2)
              and D > block_k)
    if ksplit:
        block_k = _round_up(min(block_k, D), 128)
        Dp = _round_up(D, block_k)
        if Dp != D:
            # Zero-pad only the contraction dim (zeros change neither the dot
            # product nor the norms); N/M ragged edges are handled by Pallas.
            x = jnp.pad(x, ((0, 0), (0, Dp - D)))
            y = jnp.pad(y, ((0, 0), (0, Dp - D)))
    else:
        Dp = D

    gn = pl.cdiv(N, block_n)
    gm = pl.cdiv(M, block_m)

    # Grid-axis order: the operand indexed by the inner axis is re-streamed once
    # per outer step.  traffic(outer=N-tiles) ~ gn*M*D, traffic(outer=M-tiles)
    # ~ gm*N*D; pick the cheaper order by swapping the index maps.
    swap = (gn * M) > (gm * N)

    def _ij(a, b):
        return (b, a) if swap else (a, b)

    if not ksplit:
        x_map = lambda a, b: (_ij(a, b)[0], 0)
        y_map = lambda a, b: (_ij(a, b)[1], 0)
        o_map = lambda a, b: _ij(a, b)
        xv_map = lambda a, b: (_ij(a, b)[0], 0)
        yv_map = lambda a, b: (0, _ij(a, b)[1])
        x_spec = pl.BlockSpec((block_n, Dp), x_map)
        y_spec = pl.BlockSpec((block_m, Dp), y_map)
        o_spec = pl.BlockSpec((block_n, block_m), o_map)
        grid = (gm, gn) if swap else (gn, gm)
        dims = ("parallel", "parallel")
        scratch = []
        kdim = Dp
    else:
        gk = Dp // block_k
        x_map = lambda a, b, k: (_ij(a, b)[0], k)
        y_map = lambda a, b, k: (_ij(a, b)[1], k)
        o_map = lambda a, b, k: _ij(a, b)
        xv_map = lambda a, b, k: (_ij(a, b)[0], 0)
        yv_map = lambda a, b, k: (0, _ij(a, b)[1])
        x_spec = pl.BlockSpec((block_n, block_k), x_map)
        y_spec = pl.BlockSpec((block_m, block_k), y_map)
        o_spec = pl.BlockSpec((block_n, block_m), o_map)
        grid = ((gm, gn) if swap else (gn, gm)) + (gk,)
        dims = ("parallel", "parallel", "arbitrary")
        scratch = [pltpu.VMEM((block_n, block_m), jnp.float32)]
        kdim = block_k

    in_specs = [x_spec, y_spec]
    args = [x, y]

    if sim_type == "dot":
        kernel = functools.partial(_dot_kernel_ksplit if ksplit else _dot_kernel,
                                   inv_temp=inv_temp, precision=precision)
    elif sim_type == "cosine":
        # Hoisted row norms, computed once in the inputs' native dtype (no f32
        # copies of x / y in HBM); torch.nn.CosineSimilarity-style clamp to eps.
        x_sq = jnp.einsum("nd,nd->n", x, x, preferred_element_type=jnp.float32)
        y_sq = jnp.einsum("md,md->m", y, y, preferred_element_type=jnp.float32)
        x_inv = (1.0 / jnp.maximum(jnp.sqrt(x_sq), eps))[:, None]      # (N, 1)
        y_inv = (1.0 / jnp.maximum(jnp.sqrt(y_sq), eps))[None, :]      # (1, M)
        in_specs += [pl.BlockSpec((block_n, 1), xv_map),
                     pl.BlockSpec((1, block_m), yv_map)]
        args += [x_inv, y_inv]
        kernel = functools.partial(_cos_kernel_ksplit if ksplit else _cos_kernel,
                                   inv_temp=inv_temp, precision=precision)
    else:
        raise Exception(f"Unsupported similarity type: {sim_type}")

    # Scoped-VMEM sizing: double-buffered operand + output tiles, f32 accumulator
    # (K-split only), and the lane-/sublane-padded norm vectors (cosine only).
    est = (2 * (block_n + block_m) * kdim * in_itemsize
           + 2 * block_n * block_m * out_itemsize
           + (block_n * block_m * 4 if ksplit else 0))
    if sim_type == "cosine":
        est += 2 * (block_n * 128 * 4 + 8 * block_m * 4)
    vmem_limit = int(min(max(2 * est, 16 << 20), budget))

    outer_steps = max(gm if swap else gn, 1)
    restreamed_bytes = (N if swap else M) * Dp * in_itemsize
    cost = pl.CostEstimate(
        flops=int(2 * N * M * D),
        transcendentals=0,
        bytes_accessed=int((N + M) * Dp * in_itemsize
                           + (outer_steps - 1) * restreamed_bytes
                           + N * M * out_itemsize),
    )

    return pl.pallas_call(
        kernel,
        out_shape=jax.ShapeDtypeStruct((N, M), out_dtype),
        grid=grid,
        in_specs=in_specs,
        out_specs=o_spec,
        scratch_shapes=scratch,
        cost_estimate=cost,
        compiler_params=pltpu.CompilerParams(
            dimension_semantics=dims,
            vmem_limit_bytes=vmem_limit,
        ),
    )(*args)


# ----------------------------- reference / demo ----------------------------- #

def _reference(x, y, temp, sim_type, eps=1e-8):
    hp = jax.lax.Precision.HIGHEST
    if sim_type == "dot":
        return jnp.matmul(x, y.T, precision=hp) / temp
    xn = jnp.maximum(jnp.linalg.norm(x, axis=-1, keepdims=True), eps)
    yn = jnp.maximum(jnp.linalg.norm(y, axis=-1, keepdims=True), eps)
    return (jnp.matmul(x, y.T, precision=hp) / (xn * yn.T)) / temp


if __name__ == "__main__":
    temp = 0.05  # SimCSE-style temperature

    # Small case matching the module's typical use (batch of embeddings, hidden=32).
    kx, ky = jax.random.split(jax.random.PRNGKey(0))
    x = jax.random.normal(kx, (8, 32), dtype=jnp.float32)
    y = jax.random.normal(ky, (8, 32), dtype=jnp.float32)
    for st in ("dot", "cosine"):
        out = jax.block_until_ready(similarity(x, y, temp, st))
        ref = _reference(x, y, temp, st)
        assert out.shape == ref.shape
        assert jnp.allclose(out, ref, atol=1e-3, rtol=1e-3), f"mismatch for {st}"

    # Non-divisible shapes exercising ragged edge blocks (no padding / slicing)
    # and a multi-step 2-D parallel grid.
    kx2, ky2 = jax.random.split(jax.random.PRNGKey(1))
    x2 = jax.random.normal(kx2, (300, 96), dtype=jnp.float32)
    y2 = jax.random.normal(ky2, (200, 96), dtype=jnp.float32)
    for st in ("dot", "cosine"):
        out = jax.block_until_ready(
            similarity(x2, y2, temp, st, block_n=128, block_m=128))
        ref = _reference(x2, y2, temp, st)
        assert out.shape == ref.shape
        assert jnp.allclose(out, ref, atol=1e-3, rtol=1e-3), f"mismatch for {st}"

    # bf16 fast path (dtype-aware 16-row sublane rounding, f32 accumulation).
    xb, yb = x2.astype(jnp.bfloat16), y2.astype(jnp.bfloat16)
    out = jax.block_until_ready(similarity(xb, yb, temp, "dot"))
    ref = jnp.matmul(xb.astype(jnp.float32), yb.astype(jnp.float32).T) / temp
    assert jnp.allclose(out, ref, atol=2e-1, rtol=2e-2), "mismatch for bf16 dot"

    print("KERNEL_OK")
</pallas_src>

<mosaic_0001>
module attributes {stable_mosaic.version = 11 : i64} {
  func.func @_dot_kernel(%arg0: i32, %arg1: i32, %arg2: memref<8x32xf32, #tpu.memory_space<vmem>>, %arg3: memref<128x32xf32, #tpu.memory_space<vmem>>, %arg4: memref<8x128xf32, #tpu.memory_space<vmem>>) attributes {dimension_semantics = [#tpu.dimension_semantics<parallel>, #tpu.dimension_semantics<parallel>], iteration_bounds = array<i64: 1, 1>, scalar_prefetch = 0 : i64, scratch_operands = 0 : i64, tpu.core_type = #tpu.core_type<tc>, window_params = [{transform_indices = @transform_0, window_bounds = array<i64: 8, 32>}, {transform_indices = @transform_1, window_bounds = array<i64: 128, 32>}, {transform_indices = @transform_2, window_bounds = array<i64: 8, 128>}]} {
    %c0 = arith.constant 0 : index
    %c0_0 = arith.constant 0 : index
    %0 = vector.load %arg2[%c0, %c0_0] : memref<8x32xf32, #tpu.memory_space<vmem>>, vector<8x32xf32>
    %c0_1 = arith.constant 0 : index
    %c0_2 = arith.constant 0 : index
    %1 = vector.load %arg3[%c0_1, %c0_2] : memref<128x32xf32, #tpu.memory_space<vmem>>, vector<128x32xf32>
    %cst = arith.constant dense<0.000000e+00> : vector<8x128xf32>
    %2 = tpu.matmul %0, %1, %cst {dimension_numbers = #tpu.dot_dimension_numbers<[1], [1], [0], [0], [0, 0, 1, 0], [], []>, precision = #tpu.contract_precision<fp32>} : vector<8x32xf32>, vector<128x32xf32>, vector<8x128xf32> -> vector<8x128xf32>
    %cst_3 = arith.constant 2.000000e+01 : f32
    %3 = vector.broadcast %cst_3 : f32 to vector<8x128xf32>
    %4 = arith.mulf %2, %3 : vector<8x128xf32>
    %c0_4 = arith.constant 0 : index
    %c0_5 = arith.constant 0 : index
    %5 = vector.load %arg4[%c0_4, %c0_5] : memref<8x128xf32, #tpu.memory_space<vmem>>, vector<8x128xf32>
    tpu.vector_store %arg4[%c0_4, %c0_5], %4 {strides = array<i32>} : memref<8x128xf32, #tpu.memory_space<vmem>>, vector<8x128xf32>,
    return
  }
  func.func @transform_0(%arg0: i32, %arg1: i32) -> (i32, i32) {
    %c0_i32 = arith.constant 0 : i32
    %c0_i32_0 = arith.constant 0 : i32
    return %arg0, %c0_i32 : i32, i32
  }
  func.func @transform_1(%arg0: i32, %arg1: i32) -> (i32, i32) {
    %c0_i32 = arith.constant 0 : i32
    %c0_i32_0 = arith.constant 0 : i32
    return %arg1, %c0_i32 : i32, i32
  }
  func.func @transform_2(%arg0: i32, %arg1: i32) -> (i32, i32) {
    %c0_i32 = arith.constant 0 : i32
    return %arg0, %arg1 : i32, i32
  }
}

</mosaic_0001>

<bundles_post_ra>
// kernel: tpu_custom_call.1
= control target key start
LH: loop header
LB: loop body
LE: loop exit
PB: predicated region body
PF: predicated region fallthrough
CT: control target
= control target key end

     0   :  { %7 = vsyncpa [#allocation3], 0  ;;  %s1602_s0 = inlined_call_operand.hbm [shape: f32[8,32], index: 0, kind: input, shape index: {}]   ;;  %s1603_s1 = inlined_call_operand.hbm [shape: f32[8,32], index: 1, kind: input, shape index: {}]   ;;  %s1604_s2 = inlined_call_operand.hbm [shape: f32[8,8], index: 2, kind: output, shape index: {}]  }
   0x1   :  { %8 = vsyncpa [#allocation6], 0 }
   0x2   :  { %9 = vsyncpa [#allocation4], 0  ;;  %s1311_s9 = smov [#allocation2]   ;;  %s1239_s13 = scalar_lea.hbm %s1602_s0, 128 }
   0x3   :  { %s16_s10 = sshll.u32 %s1311_s9, 4  ;;  %p1240_p0 = scmp.ne.s32.totalorder %s1602_s0, %s1239_s13  ;;  %s17_s10 = int_to_ptr.vmem [resolvable:$true] %s16_s10 }
   0x4   :  { %p1243_p1 = scmp.lt.u32.totalorder %s1239_s13, %s1602_s0 }
   0x6   :  { %p1245_p2 = pnand %p1243_p1, %p1240_p0 }
   0x8   :  { %1248 = shalt.err (!%p1245_p2)
}
   0x9   :  { %s1249_s18 = scalar_lea.vmem %s17_s10, 128  ;;  %p1254_p4 = scmp.lt.s32.totalorder %s17_s10, %s17_s10 }
   0xa   :  { %p1250_p3 = scmp.ne.s32.totalorder %s17_s10, %s1249_s18  ;;  %p1255_p5 = scmp.lt.s32.totalorder %s1249_s18, %s1249_s18 }
   0xc   :  { %p1256_p6 = por %p1255_p5, %p1254_p4 }
   0xe   :  { %p1257_p7 = pnand %p1256_p6, %p1250_p3 }
  0x10   :  { %1260 = shalt.err (!%p1257_p7)
}
  0x11   :  { %19 = dma.hbm_to_vmem [thread:$0]  %s1602_s0, 128, %s17_s10, [#allocation3]  }
  0x12   :  { %24 = vsyncadd [#allocation6], 1920  ;;  %s1312_s21 = smov [#allocation5]   ;;  %s1261_s25 = scalar_lea.hbm %s1603_s1, 128 }
  0x13   :  { %s25_s22 = sshll.u32 %s1312_s21, 4  ;;  %p1262_p8 = scmp.ne.s32.totalorder %s1603_s1, %s1261_s25  ;;  %s26_s22 = int_to_ptr.vmem [resolvable:$true] %s25_s22 }
  0x14   :  { %p1265_p9 = scmp.lt.u32.totalorder %s1261_s25, %s1603_s1 }
  0x16   :  { %p1267_p10 = pnand %p1265_p9, %p1262_p8 }
  0x18   :  { %1270 = shalt.err (!%p1267_p10)
}
  0x19   :  { %s1271_s30 = scalar_lea.vmem %s26_s22, 128  ;;  %s1275_s0 = scalar_lea.vmem %s26_s22, 2048 }
  0x1a   :  { %p1272_p11 = scmp.ne.s32.totalorder %s26_s22, %s1271_s30  ;;  %p1276_p12 = scmp.lt.s32.totalorder %s26_s22, %s26_s22 }
  0x1b   :  { %p1277_p13 = scmp.lt.s32.totalorder %s1275_s0, %s1271_s30 }
  0x1d   :  { %p1278_p0 = por %p1277_p13, %p1276_p12 }
  0x1f   :  { %p1279_p1 = pnand %p1278_p0, %p1272_p11 }
  0x21   :  { %1282 = shalt.err (!%p1279_p1)
}
  0x22   :  { %s1313_s3 = smov 128   ;;  %s1314_s4 = smov 8  }
  0x23   :  { %31 = dma.hbm_to_vmem [thread:$0]  %s1603_s1, 128, %s26_s22, [#allocation6], %s1313_s3, %s1313_s3, %s1314_s4  }
  0x24   :  { %1305 = dma.done.wait [#allocation3], 128  }
  0x25   :  { %1306 = vsyncadd [#allocation3], 4294967168 }
  0x26   :  { %1307 = dma.done.wait [#allocation6], 2048  }
  0x27   :  { %1308 = vsyncadd [#allocation6], 4294965248  ;;  %v1315_v0 = vmov 0.0|0.0   ;;  %vm1316_vm0 = vmmov 0   ;;  %v1317_v1 = vmov 0.0   ;;  %vm55_vm1 = vcmask 261120  }
  0x28   :  { %1078 = vmatprep.subr.bf16.mxu1 %v1315_v0  ;;  %1150 = vmatprep.subr.bf16.mxu0 %v1315_v0  ;;  %v39_v2 = vld [vmem:[#allocation5] sm:$0xff]  ;;  %v40_v3 = vld [vmem:[#allocation5 + $0x8] sm:$0xff]  ;;  %v41_v4 = vld [vmem:[#allocation5 + $0x10] sm:$0xff]  ;;  %s1318_s1 = smov [#allocation7]  }
  0x29   :  { %900 = vmatprep.mubr.msk.f32.mxu1 %vm1316_vm0, %v1317_v1  ;;  %1005 = vmatprep.mubr.msk.f32.mxu0 %vm1316_vm0, %v1317_v1  ;;  %v60_v5 = vsel %vm55_vm1, %v39_v2, 0  ;;  %v63_v6 = vsel %vm55_vm1, %v40_v3, 0  ;;  %v42_v7 = vld [vmem:[#allocation5 + $0x18] sm:$0xff]  ;;  %v66_v10 = vsel %vm55_vm1, %v41_v4, 0  ;;  %v43_v15 = vld [vmem:[#allocation5 + $0x20] sm:$0xff]  ;;  %v44_v16 = vld [vmem:[#allocation5 + $0x28] sm:$0xff] }
  0x2a   :  { %v108_v8 = vand.u32 4294901760, %v60_v5  ;;  %v111_v9 = vand.u32 4294901760, %v63_v6  ;;  %v69_v11 = vsel %vm55_vm1, %v42_v7, 0  ;;  %v114_v13 = vand.u32 4294901760, %v66_v10  ;;  %v45_v22 = vld [vmem:[#allocation5 + $0x30] sm:$0xff]  ;;  %v46_v23 = vld [vmem:[#allocation5 + $0x38] sm:$0xff] }
  0x2b   :  { %v117_v14 = vand.u32 4294901760, %v69_v11  ;;  %v72_v18 = vsel %vm55_vm1, %v43_v15, 0  ;;  %v75_v19 = vsel %vm55_vm1, %v44_v16, 0  ;;  %v78_v25 = vsel %vm55_vm1, %v45_v22, 0  ;;  %v47_v29 = vld [vmem:[#allocation5 + $0x40] sm:$0xff]  ;;  %v48_v30 = vld [vmem:[#allocation5 + $0x48] sm:$0xff] }
  0x2c   :  { %v1368_v12 = vpack.c.bf16 %v111_v9, %v108_v8  ;;  %v120_v20 = vand.u32 4294901760, %v72_v18  ;;  %v123_v21 = vand.u32 4294901760, %v75_v19  ;;  %v81_v26 = vsel %vm55_vm1, %v46_v23, 0  ;;  %v49_v40 = vld [vmem:[#allocation5 + $0x50] sm:$0xff]  ;;  %v50_v41 = vld [vmem:[#allocation5 + $0x58] sm:$0xff]  ;;  %v51_v60 = vld [vmem:[#allocation5 + $0x60] sm:$0xff] }
  0x2d   :  { %v1374_v17 = vpack.c.bf16 %v117_v14, %v114_v13  ;;  %v126_v27 = vand.u32 4294901760, %v78_v25  ;;  %v129_v28 = vand.u32 4294901760, %v81_v26  ;;  %v84_v32 = vsel %vm55_vm1, %v47_v29, 0  ;;  %v52_v61 = vld [vmem:[#allocation5 + $0x68] sm:$0xff]  ;;  %s756_s7 = sshll.u32 %s1318_s1, 4  ;;  %s757_s7 = int_to_ptr.vmem [resolvable:$true] %s756_s7 }
  0x2e   :  { %1080 = vmatpush3.bf16.xpose.msra.mxu1 %v1368_v12  ;;  %1152 = vmatpush3.bf16.xpose.msra.mxu0 %v1368_v12  ;;  %v1382_v24 = vpack.c.bf16 %v123_v21, %v120_v20  ;;  %v87_v33 = vsel %vm55_vm1, %v48_v30, 0  ;;  %v1394_v34 = vsub.f32 %v60_v5, %v108_v8  ;;  %v1396_v35 = vsub.f32 %v63_v6, %v111_v9  ;;  %v38_v6 = vld [vmem:[#allocation2] sm:$0xff]  ;;  %v53_v9 = vld [vmem:[#allocation5 + $0x70] sm:$0xff]  ;;  %s1283_s8 = scalar_lea.vmem %s757_s7, 128  ;;  %p1288_p3 = scmp.lt.s32.totalorder %s757_s7, %s757_s7 }
  0x2f   :  { %1081 = vmatprep.subr.bf16.mxu1 %v1315_v0  ;;  %1153 = vmatprep.subr.bf16.mxu0 %v1315_v0  ;;  %v1390_v31 = vpack.c.bf16 %v129_v28, %v126_v27  ;;  %v1398_v36 = vsub.f32 %v66_v10, %v114_v13  ;;  %v1400_v37 = vsub.f32 %v69_v11, %v117_v14  ;;  %v132_v38 = vand.u32 4294901760, %v84_v32  ;;  %v54_v10 = vld [vmem:[#allocation5 + $0x78] sm:$0xff]  ;;  %p1284_p2 = scmp.ne.s32.totalorder %s757_s7, %s1283_s8  ;;  %p1289_p4 = scmp.lt.s32.totalorder %s1283_s8, %s1283_s8 }
  0x30   :  { %v135_v39 = vand.u32 4294901760, %v87_v33  ;;  %v1127_v42 = vpack.c.bf16 %v1396_v35, %v1394_v34  ;;  %v1404_v43 = vsub.f32 %v72_v18, %v120_v20  ;;  %v1406_v44 = vsub.f32 %v75_v19, %v123_v21 }
  0x31   :  { %v1409_v45 = vsub.f32 %v78_v25, %v126_v27  ;;  %v1412_v46 = vsub.f32 %v81_v26, %v129_v28  ;;  %v1416_v47 = vsub.f32 %v84_v32, %v132_v38  ;;  %v90_v49 = vsel %vm55_vm1, %v49_v40, 0  ;;  %p1290_p5 = por %p1289_p4, %p1288_p3 }
  0x32   :  { %v1418_v48 = vsub.f32 %v87_v33, %v135_v39  ;;  %v93_v50 = vsel %vm55_vm1, %v50_v41, 0  ;;  %v1130_v51 = vpack.c.bf16 %v1400_v37, %v1398_v36  ;;  %v1133_v52 = vpack.c.bf16 %v1406_v44, %v1404_v43 }
  0x33   :  { %v1136_v53 = vpack.c.bf16 %v1412_v46, %v1409_v45  ;;  %v1430_v55 = vpack.c.bf16 %v135_v39, %v132_v38  ;;  %v138_v56 = vand.u32 4294901760, %v90_v49  ;;  %v141_v57 = vand.u32 4294901760, %v93_v50  ;;  %p1291_p6 = pnand %p1290_p5, %p1284_p2 }
  0x34   :  { %v1139_v54 = vpack.c.bf16 %v1418_v48, %v1416_v47  ;;  %v96_v63 = vsel %vm55_vm1, %v51_v60, 0  ;;  %v99_v2 = vsel %vm55_vm1, %v52_v61, 0  ;;  %v57_v11 = vsel %vm55_vm1, %v38_v6, 0 }
  0x35   :  { %v1432_v58 = vsub.f32 %v90_v49, %v138_v56  ;;  %v1434_v59 = vsub.f32 %v93_v50, %v141_v57  ;;  %v1444_v3 = vpack.c.bf16 %v141_v57, %v138_v56  ;;  %v144_v4 = vand.u32 4294901760, %v96_v63 }
  0x36   :  { %1083 = vmatpush3.bf16.xpose.msra.mxu1 %v1374_v17  ;;  %1155 = vmatpush3.bf16.xpose.msra.mxu0 %v1374_v17  ;;  %v147_v5 = vand.u32 4294901760, %v99_v2  ;;  %v102_v14 = vsel %vm55_vm1, %v53_v9, 0  ;;  %v105_v15 = vsel %vm55_vm1, %v54_v10, 0  ;;  %v1459_v16 = vand.u32 4294901760, %v57_v11 }
  0x37   :  { %1084 = vmatprep.subr.bf16.mxu1 %v1315_v0  ;;  %1156 = vmatprep.subr.bf16.mxu0 %v1315_v0  ;;  %v1142_v62 = vpack.c.bf16 %v1434_v59, %v1432_v58  ;;  %v1446_v7 = vsub.f32 %v96_v63, %v144_v4  ;;  %v150_v19 = vand.u32 4294901760, %v102_v14  ;;  %v153_v20 = vand.u32 4294901760, %v105_v15 }
  0x38   :  { %v1448_v8 = vsub.f32 %v99_v2, %v147_v5  ;;  %v1461_v18 = vpack.c.bf16 %v147_v5, %v144_v4  ;;  %v1468_v23 = vsub.f32 %v57_v11, %v1459_v16  ;;  %v201_v25 = vand.u32 4294901760, %v1394_v34 }
  0x39   :  { %v1463_v21 = vsub.f32 %v102_v14, %v150_v19  ;;  %v1465_v22 = vsub.f32 %v105_v15, %v153_v20  ;;  %v208_v26 = vand.u32 4294901760, %v1396_v35  ;;  %v1479_v29 = vpack.c.bf16 %v153_v20, %v150_v19 }
  0x3a   :  { %v1145_v13 = vpack.c.bf16 %v1448_v8, %v1446_v7  ;;  %v190_v28 = vand.u32 4294901760, %v1468_v23  ;;  %v202_v30 = vsub.f32 %v1394_v34, %v201_v25  ;;  %v215_v40 = vand.u32 4294901760, %v1398_v36 }
  0x3b   :  { %v1148_v27 = vpack.c.bf16 %v1465_v22, %v1463_v21  ;;  %v209_v32 = vsub.f32 %v1396_v35, %v208_v26  ;;  %v222_v41 = vand.u32 4294901760, %v1400_v37  ;;  %v1175_v56 = vpack.c.bf16 %v208_v26, %v201_v25 }
  0x3c   :  { %v191_v33 = vsub.f32 %v1468_v23, %v190_v28  ;;  %v203_v38 = vand.u32 4294901760, %v202_v30  ;;  %v216_v57 = vsub.f32 %v1398_v36, %v215_v40  ;;  %v229_v2 = vand.u32 4294901760, %v1404_v43 }
  0x3d   :  { %v210_v39 = vand.u32 4294901760, %v209_v32  ;;  %v223_v60 = vsub.f32 %v1400_v37, %v222_v41  ;;  %v236_v4 = vand.u32 4294901760, %v1406_v44  ;;  %v1178_v6 = vpack.c.bf16 %v222_v41, %v215_v40 }
  0x3e   :  { %1086 = vmatpush3.bf16.xpose.msra.mxu1 %v1382_v24  ;;  %1158 = vmatpush3.bf16.xpose.msra.mxu0 %v1382_v24  ;;  %v192_v49 = vand.u32 4294901760, %v191_v33  ;;  %v217_v61 = vand.u32 4294901760, %v216_v57  ;;  %v230_v9 = vsub.f32 %v1404_v43, %v229_v2  ;;  %v243_v15 = vand.u32 4294901760, %v1409_v45 }
  0x3f   :  { %1087 = vmatprep.subr.bf16.mxu1 %v1315_v0  ;;  %1159 = vmatprep.subr.bf16.mxu0 %v1315_v0  ;;  %v1103_v50 = vpack.c.bf16 %v210_v39, %v203_v38  ;;  %v224_v63 = vand.u32 4294901760, %v223_v60  ;;  %v237_v10 = vsub.f32 %v1406_v44, %v236_v4  ;;  %v250_v19 = vand.u32 4294901760, %v1412_v46 }
  0x40   :  { %v231_v11 = vand.u32 4294901760, %v230_v9  ;;  %v1181_v25 = vpack.c.bf16 %v236_v4, %v229_v2  ;;  %v244_v26 = vsub.f32 %v1409_v45, %v243_v15  ;;  %v257_v33 = vand.u32 4294901760, %v1416_v47 }
  0x41   :  { %v1106_v5 = vpack.c.bf16 %v224_v63, %v217_v61  ;;  %v238_v14 = vand.u32 4294901760, %v237_v10  ;;  %v264_v38 = vand.u32 4294901760, %v1418_v48  ;;  %v1184_v40 = vpack.c.bf16 %v250_v19, %v243_v15 }
  0x42   :  { %v245_v30 = vand.u32 4294901760, %v244_v26  ;;  %v258_v41 = vsub.f32 %v1416_v47, %v257_v33  ;;  %v271_v57 = vand.u32 4294901760, %v1432_v58  ;;  %v278_v60 = vand.u32 4294901760, %v1434_v59 }
  0x43   :  { %v1109_v20 = vpack.c.bf16 %v238_v14, %v231_v11  ;;  %v1187_v63 = vpack.c.bf16 %v264_v38, %v257_v33  ;;  %v285_v9 = vand.u32 4294901760, %v1446_v7  ;;  %v292_v10 = vand.u32 4294901760, %v1448_v8 }
  0x44   :  { %v272_v2 = vsub.f32 %v1432_v58, %v271_v57  ;;  %v279_v4 = vsub.f32 %v1434_v59, %v278_v60  ;;  %v1190_v14 = vpack.c.bf16 %v278_v60, %v271_v57  ;;  %v299_v26 = vand.u32 4294901760, %v1463_v21 }
  0x45   :  { %v286_v15 = vsub.f32 %v1446_v7, %v285_v9 }
  0x46   :  { %1089 = vmatpush3.bf16.xpose.msra.mxu1 %v1390_v31  ;;  %1161 = vmatpush3.bf16.xpose.msra.mxu0 %v1390_v31  ;;  %v300_v33 = vsub.f32 %v1463_v21, %v299_v26 }
  0x47   :  { %1090 = vmatprep.subr.bf16.mxu1 %v1315_v0  ;;  %1162 = vmatprep.subr.bf16.mxu0 %v1315_v0 }
  0x4e   :  { %1092 = vmatpush3.bf16.xpose.msra.mxu1 %v1430_v55  ;;  %1164 = vmatpush3.bf16.xpose.msra.mxu0 %v1430_v55 }
  0x4f   :  { %1093 = vmatprep.subr.bf16.mxu1 %v1315_v0  ;;  %1165 = vmatprep.subr.bf16.mxu0 %v1315_v0 }
  0x56   :  { %1095 = vmatpush3.bf16.xpose.msra.mxu1 %v1444_v3  ;;  %1167 = vmatpush3.bf16.xpose.msra.mxu0 %v1444_v3 }
  0x57   :  { %1096 = vmatprep.subr.bf16.mxu1 %v1315_v0  ;;  %1168 = vmatprep.subr.bf16.mxu0 %v1315_v0 }
  0x5e   :  { %1098 = vmatpush3.bf16.xpose.msra.mxu1 %v1461_v18  ;;  %1170 = vmatpush3.bf16.xpose.msra.mxu0 %v1461_v18 }
  0x5f   :  { %1099 = vmatprep.subr.bf16.mxu1 %v1315_v0  ;;  %1171 = vmatprep.subr.bf16.mxu0 %v1315_v0 }
  0x66   :  { %1101 = vmatpush3.bf16.xpose.msra.mxu1 %v1479_v29  ;;  %1173 = vmatpush3.bf16.xpose.msra.mxu0 %v1479_v29 }
  0x67   :  { %1102 = vmatprep.subr.bf16.mxu1 %v1315_v0  ;;  %1174 = vmatprep.subr.bf16.mxu0 %v1315_v0 }
  0x6d   :  { %901 = vmatmul.mubr.f32.vlgmr.msra.gmra.mrb[0].mxu1 %v192_v49  ;;  %1006 = vmatmul.mubr.f32.vlgmr.msra.gmra.mrb[0].mxu0 %v190_v28  ;;  %v251_v28 = vsub.f32 %v1412_v46, %v250_v19  ;;  %v265_v49 = vsub.f32 %v1418_v48, %v264_v38  ;;  %v293_v19 = vsub.f32 %v1448_v8, %v292_v10 }
  0x6e   :  { %1104 = vmatpush3.bf16.xpose.msra.mxu1 %v1103_v50  ;;  %1176 = vmatpush3.bf16.xpose.msra.mxu0 %v1175_v56  ;;  %v259_v50 = vand.u32 4294901760, %v258_v41 }
  0x6f   :  { %1105 = vmatprep.subr.bf16.mxu1 %v1315_v0  ;;  %1177 = vmatprep.subr.bf16.mxu0 %v1315_v0  ;;  %v252_v32 = vand.u32 4294901760, %v251_v28  ;;  %v266_v56 = vand.u32 4294901760, %v265_v49  ;;  %v306_v28 = vand.u32 4294901760, %v1465_v22 }
  0x70   :  { %935 = vmatprep.mubr.msk.f32.mxu1 %vm1316_vm0, %v1317_v1  ;;  %1040 = vmatprep.mubr.msk.f32.mxu0 %vm1316_vm0, %v1317_v1 }
  0x71   :  { %v1112_v39 = vpack.c.bf16 %v252_v32, %v245_v30  ;;  %v1115_v61 = vpack.c.bf16 %v266_v56, %v259_v50  ;;  %v1193_v32 = vpack.c.bf16 %v292_v10, %v285_v9  ;;  %v307_v38 = vsub.f32 %v1465_v22, %v306_v28 }
  0x72   :  { %v1196_v49 = vpack.c.bf16 %v306_v28, %v299_v26 }
  0x76   :  { %1107 = vmatpush3.bf16.xpose.msra.mxu1 %v1106_v5  ;;  %1179 = vmatpush3.bf16.xpose.msra.mxu0 %v1178_v6  ;;  %v273_v5 = vand.u32 4294901760, %v272_v2  ;;  %v280_v6 = vand.u32 4294901760, %v279_v4 }
  0x77   :  { %1108 = vmatprep.subr.bf16.mxu1 %v1315_v0  ;;  %1180 = vmatprep.subr.bf16.mxu0 %v1315_v0 }
  0x78   :  { %v1118_v11 = vpack.c.bf16 %v280_v6, %v273_v5 }
  0x7e   :  { %1110 = vmatpush3.bf16.xpose.msra.mxu1 %v1109_v20  ;;  %1182 = vmatpush3.bf16.xpose.msra.mxu0 %v1181_v25  ;;  %v287_v20 = vand.u32 4294901760, %v286_v15  ;;  %v294_v25 = vand.u32 4294901760, %v293_v19 }
  0x7f   :  { %1111 = vmatprep.subr.bf16.mxu1 %v1315_v0  ;;  %1183 = vmatprep.subr.bf16.mxu0 %v1315_v0 }
  0x80   :  { %v1121_v30 = vpack.c.bf16 %v294_v25, %v287_v20 }
  0x86   :  { %1113 = vmatpush3.bf16.xpose.msra.mxu1 %v1112_v39  ;;  %1185 = vmatpush3.bf16.xpose.msra.mxu0 %v1184_v40  ;;  %v301_v39 = vand.u32 4294901760, %v300_v33  ;;  %v308_v40 = vand.u32 4294901760, %v307_v38 }
  0x87   :  { %1114 = vmatprep.subr.bf16.mxu1 %v1315_v0  ;;  %1186 = vmatprep.subr.bf16.mxu0 %v1315_v0 }
  0x88   :  { %v1124_v41 = vpack.c.bf16 %v308_v40, %v301_v39 }
  0x8e   :  { %1116 = vmatpush3.bf16.xpose.msra.mxu1 %v1115_v61  ;;  %1188 = vmatpush3.bf16.xpose.msra.mxu0 %v1187_v63 }
  0x8f   :  { %1117 = vmatprep.subr.bf16.mxu1 %v1315_v0  ;;  %1189 = vmatprep.subr.bf16.mxu0 %v1315_v0 }
  0x96   :  { %1119 = vmatpush3.bf16.xpose.msra.mxu1 %v1118_v11  ;;  %1191 = vmatpush3.bf16.xpose.msra.mxu0 %v1190_v14 }
  0x97   :  { %1120 = vmatprep.subr.bf16.mxu1 %v1315_v0  ;;  %1192 = vmatprep.subr.bf16.mxu0 %v1315_v0 }
  0x9e   :  { %1122 = vmatpush3.bf16.xpose.msra.mxu1 %v1121_v30  ;;  %1194 = vmatpush3.bf16.xpose.msra.mxu0 %v1193_v32 }
  0x9f   :  { %1123 = vmatprep.subr.bf16.mxu1 %v1315_v0  ;;  %1195 = vmatprep.subr.bf16.mxu0 %v1315_v0 }
  0xa6   :  { %1125 = vmatpush3.bf16.xpose.msra.mxu1 %v1124_v41  ;;  %1197 = vmatpush3.bf16.xpose.msra.mxu0 %v1196_v49 }
  0xa7   :  { %1126 = vmatprep.subr.bf16.mxu1 %v1315_v0  ;;  %1198 = vmatprep.subr.bf16.mxu0 %v1315_v0 }
  0xad   :  { %936 = vmatmul.mubr.f32.vlgmr.msra.gmra.mrb[0].mxu1 %v1459_v16  ;;  %1041 = vmatmul.mubr.f32.vlgmr.msra.gmra.mrb[0].mxu0 %v1459_v16 }
  0xae   :  { %1128 = vmatpush3.bf16.xpose.msra.mxu1 %v1127_v42  ;;  %1200 = vmatpush3.bf16.xpose.msra.mxu0 %v1368_v12 }
  0xaf   :  { %1129 = vmatprep.subr.bf16.mxu1 %v1315_v0  ;;  %1201 = vmatprep.subr.bf16.mxu0 %v1315_v0 }
  0xb0   :  { %970 = vmatprep.mubr.msk.f32.mxu1 %vm1316_vm0, %v1317_v1  ;;  %1075 = vmatprep.mubr.msk.f32.mxu0 %vm1316_vm0, %v1317_v1 }
  0xb6   :  { %1131 = vmatpush3.bf16.xpose.msra.mxu1 %v1130_v51  ;;  %1203 = vmatpush3.bf16.xpose.msra.mxu0 %v1374_v17 }
  0xb7   :  { %1132 = vmatprep.subr.bf16.mxu1 %v1315_v0  ;;  %1204 = vmatprep.subr.bf16.mxu0 %v1315_v0 }
  0xbe   :  { %1134 = vmatpush3.bf16.xpose.msra.mxu1 %v1133_v52  ;;  %1206 = vmatpush3.bf16.xpose.msra.mxu0 %v1382_v24 }
  0xbf   :  { %1135 = vmatprep.subr.bf16.mxu1 %v1315_v0  ;;  %1207 = vmatprep.subr.bf16.mxu0 %v1315_v0 }
  0xc6   :  { %1137 = vmatpush3.bf16.xpose.msra.mxu1 %v1136_v53  ;;  %1209 = vmatpush3.bf16.xpose.msra.mxu0 %v1390_v31 }
  0xc7   :  { %1138 = vmatprep.subr.bf16.mxu1 %v1315_v0  ;;  %1210 = vmatprep.subr.bf16.mxu0 %v1315_v0 }
  0xce   :  { %1140 = vmatpush3.bf16.xpose.msra.mxu1 %v1139_v54  ;;  %1212 = vmatpush3.bf16.xpose.msra.mxu0 %v1430_v55 }
  0xcf   :  { %1141 = vmatprep.subr.bf16.mxu1 %v1315_v0  ;;  %1213 = vmatprep.subr.bf16.mxu0 %v1315_v0 }
  0xd6   :  { %1143 = vmatpush3.bf16.xpose.msra.mxu1 %v1142_v62  ;;  %1215 = vmatpush3.bf16.xpose.msra.mxu0 %v1444_v3 }
  0xd7   :  { %1144 = vmatprep.subr.bf16.mxu1 %v1315_v0  ;;  %1216 = vmatprep.subr.bf16.mxu0 %v1315_v0 }
  0xde   :  { %1146 = vmatpush3.bf16.xpose.msra.mxu1 %v1145_v13  ;;  %1218 = vmatpush3.bf16.xpose.msra.mxu0 %v1461_v18 }
  0xdf   :  { %1147 = vmatprep.subr.bf16.mxu1 %v1315_v0  ;;  %1219 = vmatprep.subr.bf16.mxu0 %v1315_v0 }
  0xe6   :  { %1149 = vmatpush3.bf16.xpose.msra.mxu1 %v1148_v27  ;;  %1221 = vmatpush3.bf16.xpose.msra.mxu0 %v1479_v29 }
  0xed   :  { %971 = vmatmul.mubr.f32.vlgmr.msra.gmra.mrb[0].mxu1 %v1468_v23  ;;  %1076 = vmatmul.mubr.f32.vlgmr.msra.gmra.mrb[0].mxu0 %v1459_v16 }
 0x1c0   :  { %v449_v1 = vpop.f32.mrb[0].mxu1  ;;  %v744_v12 = vpop.f32.mrb[0].mxu0 }
 0x1c1   :  { %v1222_v17 = vadd.f32 %v744_v12, %v449_v1  ;;  %v972_v24 = vpop.f32.mrb[1].mxu1  ;;  %v1077_v31 = vpop.f32.mrb[1].mxu0 }
 0x1c3   :  { %v748_v34 = vmul.f32 20.0, %v1222_v17 }
 0x1c5   :  { %749 = vst [vmem:[#allocation7] sm:$0xff] %v748_v34 }
 0x1c6   :  { %1294 = shalt.err (!%p1291_p6)
}
 0x1c7   :  { %s1295_s11 = scalar_lea.hbm %s1604_s2, 128 }
 0x1c8   :  { %p1296_p7 = scmp.ne.s32.totalorder %s1604_s2, %s1295_s11  ;;  %p1299_p8 = scmp.lt.u32.totalorder %s1295_s11, %s1604_s2 }
 0x1ca   :  { %p1301_p9 = pnand %p1299_p8, %p1296_p7 }
 0x1cc   :  { %1304 = shalt.err (!%p1301_p9)
}
 0x1cd   :  { %759 = dma.vmem_to_hbm [thread:$0]  %s757_s7, 128, %s1604_s2, [#allocation4]  }
 0x1ce   :  { %1309 = dma.done.wait [#allocation4], 128  }
 0x1cf   :  { %1310 = vsyncadd [#allocation4], 4294967168 }
 0x1d0   :  { %763 = vsyncpa [#allocation3], 1 }
 0x1d1   :  { %764 = vsyncpa [#allocation6], 1 }
 0x1d2   :  { %765 = vsyncpa [#allocation4], 1 }

</bundles_post_ra>
